<compile_context>
chip_gen: v5e
topology: v5e:2x2
jax: 0.10.0
libtpu: 0.0.40
codegen_flags: <defaults>
</compile_context>

<pallas_src>
import jax
import jax.numpy as jnp
from jax.experimental import pallas as pl
from jax.experimental.pallas import tpu as pltpu


def _round_up(n, m):
    return (n + m - 1) // m * m


def _mlp_kernel(x_ref, w1_ref, b1_ref, w2_ref, b2_ref, o_ref):
    # Linear(S -> 128) on the MXU, f32 accumulation (also for bf16 inputs).
    h = jnp.dot(x_ref[...], w1_ref[...], preferred_element_type=jnp.float32)
    h = jnp.maximum(h + b1_ref[...], 0.0)                 # bias + ReLU (VPU, f32)
    # Linear(128 -> 1): degenerate N=1 GEMM -> VPU multiply + lane reduction
    # (keeps the MXU/result-FIFO out of the loop; XLU handles the 128-lane sum).
    o = jnp.sum(h * w2_ref[...], axis=-1, keepdims=True) + b2_ref[0, 0]
    o_ref[...] = o.astype(o_ref.dtype)


def value_function_forward(x, w1, b1, w2, b2, *, block_b=512, use_bf16=False):
    """x: (B, S); w1: (S, 128); b1: (128,); w2: (128, 1); b2: (1,)."""
    B, S = x.shape
    H = w1.shape[1]           # 128
    O = w2.shape[1]           # 1
    assert w1.shape == (S, H) and b1.shape == (H,)
    assert w2.shape == (H, O) and b2.shape == (O,) and O == 1

    # Batch tile: multiple of 8 (sublane), capped by block_b, never bigger
    # than the padded batch.  >=512-row tiles reach ~85% of HBM roofline.
    TB = _round_up(min(block_b, _round_up(B, 8)), 8)
    B_pad = _round_up(B, TB)

    if use_bf16:
        # Halves HBM traffic on the dominant x stream; accumulation stays f32.
        x = x.astype(jnp.bfloat16)
        w1 = w1.astype(jnp.bfloat16)

    if B_pad != B:
        x = jnp.pad(x, ((0, B_pad - B), (0, 0)))   # zero rows, sliced off below

    b1_2d = b1.reshape(1, H).astype(jnp.float32)
    w2_row = w2.reshape(1, H).astype(jnp.float32)  # (H,1) -> lane-major (1,H) row
    b2_2d = b2.reshape(1, 1).astype(jnp.float32)

    grid = (B_pad // TB,)

    itemsize = jnp.dtype(x.dtype).itemsize
    cost = pl.CostEstimate(
        flops=2 * B_pad * S * H + 4 * B_pad * H,
        transcendentals=0,
        bytes_accessed=(B_pad * S * itemsize            # x
                        + S * H * itemsize              # w1
                        + (2 * H + 1) * 4               # b1, w2 row, b2
                        + B_pad * O * 4),               # out
    )

    out = pl.pallas_call(
        _mlp_kernel,
        out_shape=jax.ShapeDtypeStruct((B_pad, O), jnp.float32),
        grid=grid,
        in_specs=[
            pl.BlockSpec((TB, S), lambda i: (i, 0)),          # x: tiled over batch
            pl.BlockSpec((S, H), lambda i: (0, 0)),           # w1: resident
            pl.BlockSpec((1, H), lambda i: (0, 0)),           # b1: resident
            pl.BlockSpec((1, H), lambda i: (0, 0)),           # w2 row: resident
            pl.BlockSpec((1, 1), lambda i: (0, 0),            # b2: SMEM scalar
                         memory_space=pltpu.MemorySpace.SMEM),
        ],
        out_specs=pl.BlockSpec((TB, O), lambda i: (i, 0)),
        compiler_params=pltpu.CompilerParams(
            dimension_semantics=("parallel",),   # shard batch across v7x's 2 TCs
        ),
        cost_estimate=cost,
    )(x, w1, b1_2d, w2_row, b2_2d)

    return out[:B]


def init_params(key, state_space_cardinality, hidden=128, out=1):
    """Deterministic synthetic init mirroring nn.Linear shapes (transposed)."""
    k1, k2, k3, k4 = jax.random.split(key, 4)
    bound1 = 1.0 / jnp.sqrt(state_space_cardinality)
    bound2 = 1.0 / jnp.sqrt(hidden)
    w1 = jax.random.uniform(k1, (state_space_cardinality, hidden),
                            jnp.float32, -bound1, bound1)
    b1 = jax.random.uniform(k2, (hidden,), jnp.float32, -bound1, bound1)
    w2 = jax.random.uniform(k3, (hidden, out), jnp.float32, -bound2, bound2)
    b2 = jax.random.uniform(k4, (out,), jnp.float32, -bound2, bound2)
    return w1, b1, w2, b2


if __name__ == "__main__":
    key = jax.random.PRNGKey(0)
    kx1, kx2, kp = jax.random.split(key, 3)

    S = 16                         # state_space_cardinality
    w1, b1, w2, b2 = init_params(kp, S)

    # Case 1: small aligned batch, single grid step.
    x8 = jax.random.normal(kx1, (8, S), jnp.float32)
    y8 = jax.block_until_ready(value_function_forward(x8, w1, b1, w2, b2))
    ref8 = jnp.maximum(x8 @ w1 + b1, 0.0) @ w2 + b2
    assert y8.shape == (8, 1)
    assert jnp.allclose(y8, ref8, atol=1e-5, rtol=1e-5), "mismatch (case 1)"

    # Case 2: ragged batch + multi-step grid (exercises padding + tiling path).
    x13 = jax.random.normal(kx2, (13, S), jnp.float32)
    y13 = jax.block_until_ready(
        value_function_forward(x13, w1, b1, w2, b2, block_b=8))
    ref13 = jnp.maximum(x13 @ w1 + b1, 0.0) @ w2 + b2
    assert y13.shape == (13, 1)
    assert jnp.allclose(y13, ref13, atol=1e-5, rtol=1e-5), "mismatch (case 2)"

    print("KERNEL_OK")
</pallas_src>

<mosaic_0001>
module attributes {stable_mosaic.version = 11 : i64} {
  func.func @_mlp_kernel(%arg0: i32, %arg1: memref<8x16xf32, #tpu.memory_space<vmem>>, %arg2: memref<16x128xf32, #tpu.memory_space<vmem>>, %arg3: memref<1x128xf32, #tpu.memory_space<vmem>>, %arg4: memref<1x128xf32, #tpu.memory_space<vmem>>, %arg5: memref<1x1xf32, #tpu.memory_space<smem>>, %arg6: memref<8x1xf32, #tpu.memory_space<vmem>>) attributes {dimension_semantics = [#tpu.dimension_semantics<parallel>], iteration_bounds = array<i64: 1>, scalar_prefetch = 0 : i64, scratch_operands = 0 : i64, tpu.core_type = #tpu.core_type<tc>, window_params = [{transform_indices = @transform_0, window_bounds = array<i64: 8, 16>}, {pipeline_mode = #tpu.pipeline_mode<synchronous>, transform_indices = @transform_1, window_bounds = array<i64: 16, 128>}, {pipeline_mode = #tpu.pipeline_mode<synchronous>, transform_indices = @transform_2, window_bounds = array<i64: 1, 128>}, {pipeline_mode = #tpu.pipeline_mode<synchronous>, transform_indices = @transform_3, window_bounds = array<i64: 1, 128>}, {transform_indices = @transform_4, window_bounds = array<i64: 1, 1>}, {transform_indices = @transform_5, window_bounds = array<i64: 8, 1>}]} {
    %c0 = arith.constant 0 : index
    %c0_0 = arith.constant 0 : index
    %0 = vector.load %arg1[%c0, %c0_0] : memref<8x16xf32, #tpu.memory_space<vmem>>, vector<8x16xf32>
    %c0_1 = arith.constant 0 : index
    %c0_2 = arith.constant 0 : index
    %1 = vector.load %arg2[%c0_1, %c0_2] : memref<16x128xf32, #tpu.memory_space<vmem>>, vector<16x128xf32>
    %cst = arith.constant dense<0.000000e+00> : vector<8x128xf32>
    %2 = tpu.matmul %0, %1, %cst {dimension_numbers = #tpu.dot_dimension_numbers<[1], [0], [0], [1], [0, 0, 1, 1], [], []>} : vector<8x16xf32>, vector<16x128xf32>, vector<8x128xf32> -> vector<8x128xf32>
    %c0_3 = arith.constant 0 : index
    %c0_4 = arith.constant 0 : index
    %3 = vector.load %arg3[%c0_3, %c0_4] : memref<1x128xf32, #tpu.memory_space<vmem>>, vector<1x128xf32>
    %4 = vector.broadcast %3 : vector<1x128xf32> to vector<8x128xf32>
    %5 = arith.addf %2, %4 : vector<8x128xf32>
    %cst_5 = arith.constant 0.000000e+00 : f32
    %6 = vector.broadcast %cst_5 : f32 to vector<8x128xf32>
    %7 = arith.maximumf %5, %6 : vector<8x128xf32>
    %c0_6 = arith.constant 0 : index
    %c0_7 = arith.constant 0 : index
    %8 = vector.load %arg4[%c0_6, %c0_7] : memref<1x128xf32, #tpu.memory_space<vmem>>, vector<1x128xf32>
    %9 = vector.broadcast %8 : vector<1x128xf32> to vector<8x128xf32>
    %10 = arith.mulf %7, %9 : vector<8x128xf32>
    %cst_8 = arith.constant dense<0.000000e+00> : vector<8xf32>
    %11 = vector.multi_reduction <add>, %10, %cst_8 [1] : vector<8x128xf32> to vector<8xf32>
    %12 = vector.shape_cast %11 : vector<8xf32> to vector<8x1xf32>
    %c0_9 = arith.constant 0 : index
    %c0_10 = arith.constant 0 : index
    %13 = memref.load %arg5[%c0_9, %c0_10] : memref<1x1xf32, #tpu.memory_space<smem>>
    %14 = vector.broadcast %13 : f32 to vector<8x1xf32>
    %15 = arith.addf %12, %14 : vector<8x1xf32>
    %c0_11 = arith.constant 0 : index
    %c0_12 = arith.constant 0 : index
    %16 = vector.load %arg6[%c0_11, %c0_12] : memref<8x1xf32, #tpu.memory_space<vmem>>, vector<8x1xf32>
    tpu.vector_store %arg6[%c0_11, %c0_12], %15 {strides = array<i32>} : memref<8x1xf32, #tpu.memory_space<vmem>>, vector<8x1xf32>,
    return
  }
  func.func @transform_0(%arg0: i32) -> (i32, i32) {
    %c0_i32 = arith.constant 0 : i32
    %c0_i32_0 = arith.constant 0 : i32
    return %arg0, %c0_i32 : i32, i32
  }
  func.func @transform_1(%arg0: i32) -> (i32, i32) {
    %c0_i32 = arith.constant 0 : i32
    %c0_i32_0 = arith.constant 0 : i32
    %c0_i32_1 = arith.constant 0 : i32
    return %c0_i32, %c0_i32_0 : i32, i32
  }
  func.func @transform_2(%arg0: i32) -> (i32, i32) {
    %c0_i32 = arith.constant 0 : i32
    %c0_i32_0 = arith.constant 0 : i32
    %c0_i32_1 = arith.constant 0 : i32
    return %c0_i32, %c0_i32_0 : i32, i32
  }
  func.func @transform_3(%arg0: i32) -> (i32, i32) {
    %c0_i32 = arith.constant 0 : i32
    %c0_i32_0 = arith.constant 0 : i32
    %c0_i32_1 = arith.constant 0 : i32
    return %c0_i32, %c0_i32_0 : i32, i32
  }
  func.func @transform_4(%arg0: i32) -> (i32, i32) {
    %c0_i32 = arith.constant 0 : i32
    %c0_i32_0 = arith.constant 0 : i32
    %c0_i32_1 = arith.constant 0 : i32
    return %c0_i32, %c0_i32_0 : i32, i32
  }
  func.func @transform_5(%arg0: i32) -> (i32, i32) {
    %c0_i32 = arith.constant 0 : i32
    %c0_i32_0 = arith.constant 0 : i32
    return %arg0, %c0_i32 : i32, i32
  }
}

</mosaic_0001>

<bundles_post_ra>
// kernel: tpu_custom_call.1
= control target key start
LH: loop header
LB: loop body
LE: loop exit
PB: predicated region body
PF: predicated region fallthrough
CT: control target
= control target key end

     0   :  { %11 = vsyncpa [#allocation4], 0  ;;  %s212_s0 = inlined_call_operand.hbm [shape: f32[8,16], index: 0, kind: input, shape index: {}]   ;;  %s213_s1 = inlined_call_operand.hbm [shape: f32[16,128], index: 1, kind: input, shape index: {}]   ;;  %s214_s2 = inlined_call_operand.vmem [shape: f32[1,128], index: 2, kind: input, shape index: {}]   ;;  %s215_s3 = inlined_call_operand.vmem [shape: f32[1,128], index: 3, kind: input, shape index: {}]   ;;  %s216_s4 = inlined_call_operand.<no memory space> [shape: f32[1,1], index: 4, kind: input, shape index: {}]   ;;  %s217_s5 = inlined_call_operand.vmem [shape: f32[8,1], index: 5, kind: output, shape index: {}]  }
   0x1   :  { %s18_s20 = sshll.u32 %s212_s0, 4  ;;  %s19_s20 = int_to_ptr.hbm [resolvable:$true] %s18_s20 }
   0x2   :  { %12 = vsyncpa [#allocation6], 0  ;;  %s160_s21 = smov [#allocation3]   ;;  %s28_s25 = sshll.u32 %s213_s1, 4  ;;  %s29_s25 = int_to_ptr.hbm [resolvable:$true] %s28_s25 }
   0x3   :  { %s20_s22 = sshll.u32 %s160_s21, 4  ;;  %s161_s26 = smov [#allocation5]   ;;  %s21_s22 = int_to_ptr.vmem [resolvable:$true] %s20_s22 }
   0x4   :  { %23 = dma.hbm_to_vmem [thread:$0]  %s19_s20, 128, %s21_s22, [#allocation4]  }
   0x5   :  { %s30_s27 = sshll.u32 %s161_s26, 4  ;;  %s162_s28 = smov 128   ;;  %s31_s27 = int_to_ptr.vmem [resolvable:$true] %s30_s27 }
   0x6   :  { %s163_s29 = smov 8  }
   0x7   :  { %36 = dma.hbm_to_vmem [thread:$0]  %s29_s25, 256, %s31_s27, [#allocation6], %s162_s28, %s162_s28, %s163_s29  }
   0x8   :  { %156 = dma.done.wait [#allocation4], 128  }
   0x9   :  { %157 = vsyncadd [#allocation4], 4294967168 }
   0xa   :  { %158 = dma.done.wait [#allocation6], 256  }
   0xb   :  { %159 = vsyncadd [#allocation6], 4294967040  ;;  %v53_v0 = vld [vmem:[#allocation5 + $0x8] sm:$0xff]  ;;  %v52_v1 = vld [vmem:[#allocation5] sm:$0xff]  ;;  %vm58_vm0 = vcmask 130048   ;;  %v91_v9 = vstv %s216_s4  ;;  %vm93_vm1 = vcmask 7168  }
   0xc   :  { %76 = vmatpush.msra.mxu0 %v53_v0  ;;  %v51_v2 = vld [vmem:[#allocation3] sm:$0xff] }
   0xd   :  { %v106_v3 = vld [vmem:[%s214_s2] ss:$0 sm:$0xff] }
   0xe   :  { %77 = vmatpush.msra.mxu0 %v52_v1  ;;  %v107_v6 = vld [vmem:[%s215_s3] ss:$0 sm:$0xff] }
   0xf   :  { %101 = vmatmul.msk.f32.vlgmr.msra.gmra.mxu0 %vm58_vm0, %v51_v2 }
  0x8c   :  { %v79_v4 = vpop.f32.mrf.mxu0 }
  0x8d   :  { %v80_v5 = vadd.f32 %v106_v3, %v79_v4 }
  0x8f   :  { %v82_v7 = vmax.f32 %v80_v5, 0.0 }
  0x91   :  { %v87_v8 = vmul.f32 %v107_v6, %v82_v7 }
  0x93   :  { %88 = vadd.xlane.f32.xlu0 %v87_v8 }
 0x106   :  { %v89_v10 = vpop.xlane.xlu0 %88 }
 0x107   :  { %v92_v11 = vadd.f32 %v91_v9, %v89_v10 }
 0x109   :  { %94 = vst.msk [vmem:[%s217_s5] sm:$0xff] %vm93_vm1, %v92_v11 }
 0x10a   :  { %99 = vsyncpa [#allocation4], 1 }
 0x10b   :  { %100 = vsyncpa [#allocation6], 1 }

</bundles_post_ra>
